<compile_context>
chip_gen: v6e
topology: v6e:2x2x1
jax: 0.10.0
libtpu: 0.0.40
codegen_flags: <defaults>
</compile_context>

<pallas_src>
import jax
import jax.numpy as jnp
from jax.experimental import pallas as pl
from jax.experimental.pallas import tpu as pltpu


def _round_up(x: int, m: int) -> int:
    return ((x + m - 1) // m) * m


# -----------------------------------------------------------------------------
# Path A: small vocab -> whole padded table resident in VMEM, in-VMEM gather.
# -----------------------------------------------------------------------------
def _make_resident_kernel(block_rows: int):
    def kernel(ids_ref, table_ref, out_ref):
        # ids_ref:   (n_pad,)        int32 SMEM (scalar-prefetched token ids)
        # table_ref: (v_pad, d_pad)  f32   VMEM (whole padded table, resident)
        # out_ref:   (B, d_pad)      f32   VMEM (output rows for this step)
        i = pl.program_id(0)
        base = i * block_rows
        for r in range(block_rows):          # B is small & static: unrolled
            row_id = ids_ref[base + r]       # OOV / pad ids point at zero row
            out_ref[pl.ds(r, 1), :] = table_ref[pl.ds(row_id, 1), :]

    return kernel


# -----------------------------------------------------------------------------
# Path B: large vocab -> table stays in HBM; manual double-buffered row gather.
# -----------------------------------------------------------------------------
def _make_hbm_kernel(block_rows: int):
    def kernel(ids_ref, table_hbm, out_ref, buf, sem):
        # table_hbm: (v_pad, d_pad) in HBM (memory_space=pl.ANY, no auto-DMA)
        # buf:       (2, B, d_pad)  VMEM double buffer
        # sem:       (2, B)         DMA semaphores
        i = pl.program_id(0)
        nsteps = pl.num_programs(0)
        slot = i % 2

        def fetch(step, into_slot):
            base = step * block_rows
            for r in range(block_rows):
                row_id = ids_ref[base + r]
                pltpu.make_async_copy(
                    table_hbm.at[pl.ds(row_id, 1), :],
                    buf.at[into_slot, pl.ds(r, 1), :],
                    sem.at[into_slot, r],
                ).start()

        @pl.when(i == 0)
        def _():
            fetch(0, slot)                   # prime the first buffer

        @pl.when(i + 1 < nsteps)
        def _():
            fetch(i + 1, 1 - slot)           # prefetch next step's rows

        for r in range(block_rows):          # wait for this step's rows
            pltpu.make_async_copy(
                table_hbm.at[pl.ds(0, 1), :],
                buf.at[slot, pl.ds(r, 1), :],
                sem.at[slot, r],
            ).wait()

        out_ref[...] = buf[slot]

    return kernel


def vector_lookup(ids, table_padded, *, oov_id, d_orig=None, block_rows=8,
                  force_hbm=False,
                  resident_table_limit_bytes=20 * 1024 * 1024):
    """ids: (N,) int32 (OOV already mapped to `oov_id`, the zero row).
    table_padded: (v_pad, d_pad) with a zero row at `oov_id`, d_pad % 128 == 0.
    Returns (N, d_orig or d_pad) embeddings."""
    n = int(ids.shape[0])
    v_pad, d_pad = table_padded.shape
    dtype_bytes = table_padded.dtype.itemsize
    B = block_rows

    # Bucket the token count to a multiple of B (padding ids hit the zero row)
    # so the kernel is only recompiled per bucket, not per distinct N.
    n_pad = _round_up(max(n, 1), B)
    ids = ids.astype(jnp.int32)
    if n_pad != n:
        ids = jnp.concatenate(
            [ids, jnp.full((n_pad - n,), oov_id, dtype=jnp.int32)])

    grid = (n_pad // B,)
    out_shape = jax.ShapeDtypeStruct((n_pad, d_pad), table_padded.dtype)
    out_spec = pl.BlockSpec((B, d_pad), lambda i, ids_ref: (i, 0))
    table_bytes = v_pad * d_pad * dtype_bytes

    if (not force_hbm) and table_bytes <= resident_table_limit_bytes:
        # --- resident-table fast path (v7x-safe: <= ~20 MiB of 64 MiB VMEM) ---
        vmem_needed = table_bytes + 4 * B * d_pad * dtype_bytes + (1 << 20)
        out = pl.pallas_call(
            _make_resident_kernel(B),
            out_shape=out_shape,
            grid_spec=pltpu.PrefetchScalarGridSpec(
                num_scalar_prefetch=1,               # ids -> SMEM
                grid=grid,
                in_specs=[pl.BlockSpec((v_pad, d_pad),
                                       lambda i, ids_ref: (0, 0))],
                out_specs=out_spec,
            ),
            compiler_params=pltpu.CompilerParams(
                dimension_semantics=("parallel",),   # rows independent (2 TCs on v7x)
                vmem_limit_bytes=min(48 * 1024 * 1024,
                                     max(16 * 1024 * 1024, int(vmem_needed))),
            ),
            cost_estimate=pl.CostEstimate(
                flops=0, transcendentals=0,
                bytes_accessed=int(table_bytes
                                   + 2 * n_pad * d_pad * dtype_bytes
                                   + n_pad * 4)),
        )(ids, table_padded)
    else:
        # --- HBM row-gather path: only N*d_pad table bytes ever DMA'd ---
        out = pl.pallas_call(
            _make_hbm_kernel(B),
            out_shape=out_shape,
            grid_spec=pltpu.PrefetchScalarGridSpec(
                num_scalar_prefetch=1,
                grid=grid,
                in_specs=[pl.BlockSpec(memory_space=pl.ANY)],
                out_specs=out_spec,
                scratch_shapes=[
                    pltpu.VMEM((2, B, d_pad), table_padded.dtype),
                    pltpu.SemaphoreType.DMA((2, B)),
                ],
            ),
            compiler_params=pltpu.CompilerParams(
                # Cross-step prefetch of step i+1 needs sequential grid order.
                dimension_semantics=("arbitrary",),
            ),
            cost_estimate=pl.CostEstimate(
                flops=0, transcendentals=0,
                bytes_accessed=int(2 * n_pad * d_pad * dtype_bytes + n_pad * 4)),
        )(ids, table_padded)

    if n_pad != n:
        out = out[:n]
    if d_orig is not None and d_orig != d_pad:
        out = out[:, :d_orig]
    return out


class VectorTransform:
    """JAX/Pallas port of the torch VectorTransform module."""

    def __init__(self, vocab_tokens, table, *, block_rows=8):
        # TODO(synk): string tokenization / stoi lookup has no Pallas
        # equivalent; it stays host-side Python, mirroring torchtext.
        self._stoi = {tok: i for i, tok in enumerate(vocab_tokens)}
        v, d = table.shape
        self._d = d
        self._oov_id = v                       # dedicated all-zero OOV row
        self._block_rows = block_rows
        d_pad = _round_up(d, 128)              # lane-dense rows
        v_pad = _round_up(v + 1, 8)            # sublane-aligned row count
        padded = jnp.zeros((v_pad, d_pad), dtype=table.dtype)
        self._table_padded = padded.at[:v, :d].set(table)   # padded ONCE

    def __call__(self, tokens):
        ids = jnp.array([self._stoi.get(t, self._oov_id) for t in tokens],
                        dtype=jnp.int32)
        return vector_lookup(ids, self._table_padded,
                             oov_id=self._oov_id, d_orig=self._d,
                             block_rows=self._block_rows)


if __name__ == "__main__":
    key = jax.random.PRNGKey(0)

    V, D, N = 32, 128, 8            # vocab size, embedding dim, num tokens
    vocab_tokens = [f"tok{i:02d}" for i in range(V)]
    table = jax.random.normal(key, (V, D), dtype=jnp.float32)

    transform = VectorTransform(vocab_tokens, table)

    # 8 tokens: mostly in-vocab, one OOV ("unknown") which must map to zeros.
    tokens = ["tok03", "tok00", "tok31", "unknown",
              "tok16", "tok07", "tok03", "tok29"]
    out = jax.block_until_ready(transform(tokens))

    # Pure-JAX reference.
    ids = jnp.array([transform._stoi.get(t, V) for t in tokens], jnp.int32)
    ref = jnp.where((ids < V)[:, None],
                    table[jnp.clip(ids, 0, V - 1)],
                    jnp.zeros((N, D), jnp.float32))

    assert out.shape == (N, D), out.shape
    assert out.dtype == jnp.float32
    assert jnp.allclose(out, ref, atol=1e-6, rtol=1e-6)

    # Exercise the large-vocab HBM double-buffered gather path as well.
    out_hbm = jax.block_until_ready(
        vector_lookup(ids, transform._table_padded, oov_id=V, d_orig=D,
                      force_hbm=True))
    assert out_hbm.shape == (N, D)
    assert jnp.allclose(out_hbm, ref, atol=1e-6, rtol=1e-6)

    # Ragged token count (exercises id bucketing / zero-row padding).
    tokens5 = ["tok01", "nope", "tok31", "tok16", "tok02"]
    out5 = jax.block_until_ready(transform(tokens5))
    ids5 = jnp.array([transform._stoi.get(t, V) for t in tokens5], jnp.int32)
    ref5 = jnp.where((ids5 < V)[:, None],
                     table[jnp.clip(ids5, 0, V - 1)],
                     jnp.zeros((5, D), jnp.float32))
    assert out5.shape == (5, D), out5.shape
    assert jnp.allclose(out5, ref5, atol=1e-6, rtol=1e-6)

    print("KERNEL_OK")
</pallas_src>

<mosaic_0001>
module attributes {stable_mosaic.version = 11 : i64} {
  func.func @kernel(%arg0: i32, %arg1: memref<8xi32, #tpu.memory_space<smem>>, %arg2: memref<40x128xf32, #tpu.memory_space<vmem>>, %arg3: memref<8x128xf32, #tpu.memory_space<vmem>>) attributes {dimension_semantics = [#tpu.dimension_semantics<parallel>], iteration_bounds = array<i64: 1>, scalar_prefetch = 1 : i64, scratch_operands = 0 : i64, tpu.core_type = #tpu.core_type<tc>, window_params = [{pipeline_mode = #tpu.pipeline_mode<synchronous>, transform_indices = @transform_0, window_bounds = array<i64: 40, 128>}, {transform_indices = @transform_1, window_bounds = array<i64: 8, 128>}]} {
    %c8_i32 = arith.constant 8 : i32
    %0 = arith.muli %arg0, %c8_i32 : i32
    %c0_i32 = arith.constant 0 : i32
    %1 = arith.addi %0, %c0_i32 : i32
    %2 = arith.index_cast %1 : i32 to index
    %3 = memref.load %arg1[%2] : memref<8xi32, #tpu.memory_space<smem>>
    %4 = arith.index_cast %3 : i32 to index
    %c0 = arith.constant 0 : index
    %5 = vector.load %arg2[%4, %c0] : memref<40x128xf32, #tpu.memory_space<vmem>>, vector<1x128xf32>
    %c0_0 = arith.constant 0 : index
    %c0_1 = arith.constant 0 : index
    %6 = vector.load %arg3[%c0_0, %c0_1] : memref<8x128xf32, #tpu.memory_space<vmem>>, vector<1x128xf32>
    tpu.vector_store %arg3[%c0_0, %c0_1], %5 {strides = array<i32>} : memref<8x128xf32, #tpu.memory_space<vmem>>, vector<1x128xf32>,
    %c1_i32 = arith.constant 1 : i32
    %7 = arith.addi %0, %c1_i32 : i32
    %8 = arith.index_cast %7 : i32 to index
    %9 = memref.load %arg1[%8] : memref<8xi32, #tpu.memory_space<smem>>
    %10 = arith.index_cast %9 : i32 to index
    %c0_2 = arith.constant 0 : index
    %11 = vector.load %arg2[%10, %c0_2] : memref<40x128xf32, #tpu.memory_space<vmem>>, vector<1x128xf32>
    %c1 = arith.constant 1 : index
    %c0_3 = arith.constant 0 : index
    %12 = vector.load %arg3[%c1, %c0_3] : memref<8x128xf32, #tpu.memory_space<vmem>>, vector<1x128xf32>
    tpu.vector_store %arg3[%c1, %c0_3], %11 {strides = array<i32>} : memref<8x128xf32, #tpu.memory_space<vmem>>, vector<1x128xf32>,
    %c2_i32 = arith.constant 2 : i32
    %13 = arith.addi %0, %c2_i32 : i32
    %14 = arith.index_cast %13 : i32 to index
    %15 = memref.load %arg1[%14] : memref<8xi32, #tpu.memory_space<smem>>
    %16 = arith.index_cast %15 : i32 to index
    %c0_4 = arith.constant 0 : index
    %17 = vector.load %arg2[%16, %c0_4] : memref<40x128xf32, #tpu.memory_space<vmem>>, vector<1x128xf32>
    %c2 = arith.constant 2 : index
    %c0_5 = arith.constant 0 : index
    %18 = vector.load %arg3[%c2, %c0_5] : memref<8x128xf32, #tpu.memory_space<vmem>>, vector<1x128xf32>
    tpu.vector_store %arg3[%c2, %c0_5], %17 {strides = array<i32>} : memref<8x128xf32, #tpu.memory_space<vmem>>, vector<1x128xf32>,
    %c3_i32 = arith.constant 3 : i32
    %19 = arith.addi %0, %c3_i32 : i32
    %20 = arith.index_cast %19 : i32 to index
    %21 = memref.load %arg1[%20] : memref<8xi32, #tpu.memory_space<smem>>
    %22 = arith.index_cast %21 : i32 to index
    %c0_6 = arith.constant 0 : index
    %23 = vector.load %arg2[%22, %c0_6] : memref<40x128xf32, #tpu.memory_space<vmem>>, vector<1x128xf32>
    %c3 = arith.constant 3 : index
    %c0_7 = arith.constant 0 : index
    %24 = vector.load %arg3[%c3, %c0_7] : memref<8x128xf32, #tpu.memory_space<vmem>>, vector<1x128xf32>
    tpu.vector_store %arg3[%c3, %c0_7], %23 {strides = array<i32>} : memref<8x128xf32, #tpu.memory_space<vmem>>, vector<1x128xf32>,
    %c4_i32 = arith.constant 4 : i32
    %25 = arith.addi %0, %c4_i32 : i32
    %26 = arith.index_cast %25 : i32 to index
    %27 = memref.load %arg1[%26] : memref<8xi32, #tpu.memory_space<smem>>
    %28 = arith.index_cast %27 : i32 to index
    %c0_8 = arith.constant 0 : index
    %29 = vector.load %arg2[%28, %c0_8] : memref<40x128xf32, #tpu.memory_space<vmem>>, vector<1x128xf32>
    %c4 = arith.constant 4 : index
    %c0_9 = arith.constant 0 : index
    %30 = vector.load %arg3[%c4, %c0_9] : memref<8x128xf32, #tpu.memory_space<vmem>>, vector<1x128xf32>
    tpu.vector_store %arg3[%c4, %c0_9], %29 {strides = array<i32>} : memref<8x128xf32, #tpu.memory_space<vmem>>, vector<1x128xf32>,
    %c5_i32 = arith.constant 5 : i32
    %31 = arith.addi %0, %c5_i32 : i32
    %32 = arith.index_cast %31 : i32 to index
    %33 = memref.load %arg1[%32] : memref<8xi32, #tpu.memory_space<smem>>
    %34 = arith.index_cast %33 : i32 to index
    %c0_10 = arith.constant 0 : index
    %35 = vector.load %arg2[%34, %c0_10] : memref<40x128xf32, #tpu.memory_space<vmem>>, vector<1x128xf32>
    %c5 = arith.constant 5 : index
    %c0_11 = arith.constant 0 : index
    %36 = vector.load %arg3[%c5, %c0_11] : memref<8x128xf32, #tpu.memory_space<vmem>>, vector<1x128xf32>
    tpu.vector_store %arg3[%c5, %c0_11], %35 {strides = array<i32>} : memref<8x128xf32, #tpu.memory_space<vmem>>, vector<1x128xf32>,
    %c6_i32 = arith.constant 6 : i32
    %37 = arith.addi %0, %c6_i32 : i32
    %38 = arith.index_cast %37 : i32 to index
    %39 = memref.load %arg1[%38] : memref<8xi32, #tpu.memory_space<smem>>
    %40 = arith.index_cast %39 : i32 to index
    %c0_12 = arith.constant 0 : index
    %41 = vector.load %arg2[%40, %c0_12] : memref<40x128xf32, #tpu.memory_space<vmem>>, vector<1x128xf32>
    %c6 = arith.constant 6 : index
    %c0_13 = arith.constant 0 : index
    %42 = vector.load %arg3[%c6, %c0_13] : memref<8x128xf32, #tpu.memory_space<vmem>>, vector<1x128xf32>
    tpu.vector_store %arg3[%c6, %c0_13], %41 {strides = array<i32>} : memref<8x128xf32, #tpu.memory_space<vmem>>, vector<1x128xf32>,
    %c7_i32 = arith.constant 7 : i32
    %43 = arith.addi %0, %c7_i32 : i32
    %44 = arith.index_cast %43 : i32 to index
    %45 = memref.load %arg1[%44] : memref<8xi32, #tpu.memory_space<smem>>
    %46 = arith.index_cast %45 : i32 to index
    %c0_14 = arith.constant 0 : index
    %47 = vector.load %arg2[%46, %c0_14] : memref<40x128xf32, #tpu.memory_space<vmem>>, vector<1x128xf32>
    %c7 = arith.constant 7 : index
    %c0_15 = arith.constant 0 : index
    %48 = vector.load %arg3[%c7, %c0_15] : memref<8x128xf32, #tpu.memory_space<vmem>>, vector<1x128xf32>
    tpu.vector_store %arg3[%c7, %c0_15], %47 {strides = array<i32>} : memref<8x128xf32, #tpu.memory_space<vmem>>, vector<1x128xf32>,
    return
  }
  func.func @transform_0(%arg0: i32, %arg1: memref<8xi32, #tpu.memory_space<smem>>) -> (i32, i32) {
    %c0_i32 = arith.constant 0 : i32
    %c0_i32_0 = arith.constant 0 : i32
    %c0_i32_1 = arith.constant 0 : i32
    return %c0_i32, %c0_i32_0 : i32, i32
  }
  func.func @transform_1(%arg0: i32, %arg1: memref<8xi32, #tpu.memory_space<smem>>) -> (i32, i32) {
    %c0_i32 = arith.constant 0 : i32
    %c0_i32_0 = arith.constant 0 : i32
    return %arg0, %c0_i32 : i32, i32
  }
}

</mosaic_0001>

<bundles_post_ra>
// kernel: tpu_custom_call.1
= control target key start
LH: loop header
LB: loop body
LE: loop exit
PB: predicated region body
PF: predicated region fallthrough
CT: control target
= control target key end

     0   :  { %s157_s9 = smov [#allocation3]   ;;  %s186_s0 = inlined_call_operand.hbm [shape: s32[8], index: 0, kind: input, shape index: {}]   ;;  %s187_s1 = inlined_call_operand.hbm [shape: f32[40,128], index: 1, kind: input, shape index: {}]   ;;  %s188_s2 = inlined_call_operand.hbm [shape: f32[8,128], index: 2, kind: output, shape index: {}]  }
   0x1   :  { %8 = dma.hbm_to_smem %s186_s0, 16, %s157_s9, [#allocation2] }
   0x2   :  { %151 = dma.done.wait [#allocation2], 16 }
   0x3   :  { %152 = vsyncadd [#allocation2], 4294967280 }
   0x4   :  { %10 = sfence }
   0x5   :  { %11 = vsyncpa [#allocation5], 0 }
   0x6   :  { %12 = vsyncpa [#allocation6], 0  ;;  %s158_s12 = smov [#allocation4]  }
   0x7   :  { %s18_s13 = sshll.u32 %s158_s12, 4  ;;  %s19_s13 = int_to_ptr.vmem [resolvable:$true] %s18_s13 }
   0x8   :  { %s119_s14 = scalar_lea.vmem %s19_s13, 640  ;;  %p124_p1 = scmp.lt.s32.totalorder %s19_s13, %s19_s13 }
   0x9   :  { %p120_p0 = scmp.ne.s32.totalorder %s19_s13, %s119_s14  ;;  %p125_p2 = scmp.lt.s32.totalorder %s119_s14, %s119_s14 }
   0xb   :  { %p126_p3 = por %p125_p2, %p124_p1 }
   0xd   :  { %p127_p4 = pnand %p126_p3, %p120_p0 }
   0xf   :  { %130 = shalt.err (!%p127_p4)
}
  0x10   :  { %s159_s15 = smov 128   ;;  %s160_s16 = smov 8  }
  0x11   :  { %24 = dma.hbm_to_vmem [thread:$0]  %s187_s1, 640, %s19_s13, [#allocation5], %s159_s15, %s159_s15, %s160_s16  }
  0x12   :  { %153 = dma.done.wait [#allocation5], 640  }
  0x13   :  { %154 = vsyncadd [#allocation5], 4294966656  ;;  %s29_s0 = sld [smem:[#allocation3]]  ;;  %s161_s29 = smov [#allocation7]  }
  0x14   :  { %s91_s19 = sld [smem:[#allocation3 + $0x1]]  ;;  %s74_s30 = sshll.u32 %s161_s29, 4  ;;  %s75_s30 = int_to_ptr.vmem [resolvable:$true] %s74_s30 }
  0x15   :  { %s92_s20 = sld [smem:[#allocation3 + $0x2]]  ;;  %s131_s7 = scalar_lea.vmem %s75_s30, 128 }
  0x16   :  { %s93_s21 = sld [smem:[#allocation3 + $0x3]]  ;;  %p132_p5 = scmp.ne.s32.totalorder %s75_s30, %s131_s7 }
  0x17   :  { %s94_s22 = sld [smem:[#allocation3 + $0x4]]  ;;  %p136_p6 = scmp.lt.s32.totalorder %s75_s30, %s75_s30 }
  0x18   :  { %s95_s23 = sld [smem:[#allocation3 + $0x5]]  ;;  %p137_p7 = scmp.lt.s32.totalorder %s131_s7, %s131_s7 }
  0x19   :  { %s96_s24 = sld [smem:[#allocation3 + $0x6]]  ;;  %s30_s25 = scalar_lea.vmem [#allocation4], %s29_s0 }
  0x1a   :  { %v31_v0 = vld [vmem:[%s30_s25] sm:$0x1]  ;;  %s97_s26 = sld [smem:[#allocation3 + $0x7]]  ;;  %s35_s27 = scalar_lea.vmem [#allocation4], %s91_s19 }
  0x1b   :  { %32 = vst [vmem:[#allocation7] sm:$0x1] %v31_v0  ;;  %v36_v1 = vld [vmem:[%s35_s27] sm:$0x1]  ;;  %s40_s28 = scalar_lea.vmem [#allocation4], %s92_s20  ;;  %p138_p8 = por %p137_p7, %p136_p6 }
  0x1c   :  { %37 = vst [vmem:[#allocation7 + $0x1] sm:$0x1] %v36_v1  ;;  %v41_v2 = vld [vmem:[%s40_s28] sm:$0x1]  ;;  %s45_s1 = scalar_lea.vmem [#allocation4], %s93_s21 }
  0x1d   :  { %42 = vst [vmem:[#allocation7 + $0x2] sm:$0x1] %v41_v2  ;;  %v46_v3 = vld [vmem:[%s45_s1] sm:$0x1]  ;;  %s50_s3 = scalar_lea.vmem [#allocation4], %s94_s22  ;;  %p139_p9 = pnand %p138_p8, %p132_p5 }
  0x1e   :  { %47 = vst [vmem:[#allocation7 + $0x3] sm:$0x1] %v46_v3  ;;  %v51_v4 = vld [vmem:[%s50_s3] sm:$0x1]  ;;  %s55_s4 = scalar_lea.vmem [#allocation4], %s95_s23 }
  0x1f   :  { %52 = vst [vmem:[#allocation7 + $0x4] sm:$0x1] %v51_v4  ;;  %v56_v5 = vld [vmem:[%s55_s4] sm:$0x1]  ;;  %s60_s5 = scalar_lea.vmem [#allocation4], %s96_s24 }
  0x20   :  { %57 = vst [vmem:[#allocation7 + $0x5] sm:$0x1] %v56_v5  ;;  %v61_v6 = vld [vmem:[%s60_s5] sm:$0x1]  ;;  %s65_s6 = scalar_lea.vmem [#allocation4], %s97_s26 }
  0x21   :  { %62 = vst [vmem:[#allocation7 + $0x6] sm:$0x1] %v61_v6  ;;  %v66_v7 = vld [vmem:[%s65_s6] sm:$0x1] }
  0x22   :  { %67 = vst [vmem:[#allocation7 + $0x7] sm:$0x1] %v66_v7 }
  0x23   :  { %142 = shalt.err (!%p139_p9)
}
  0x24   :  { %77 = dma.vmem_to_hbm [thread:$0]  %s75_s30, 128, %s188_s2, [#allocation6]  }
  0x25   :  { %155 = dma.done.wait [#allocation6], 128  }
  0x26   :  { %156 = vsyncadd [#allocation6], 4294967168 }
  0x27   :  { %81 = vsyncpa [#allocation5], 1 }
  0x28   :  { %82 = vsyncpa [#allocation6], 1 }

</bundles_post_ra>
